<compile_context>
chip_gen: v7x
topology: tpu7x:2x2x1
jax: 0.10.0
libtpu: 0.0.40
codegen_flags: <defaults>
</compile_context>

<pallas_src>
import jax
import jax.numpy as jnp
from jax.experimental import pallas as pl
from jax.experimental.pallas import tpu as pltpu

LANE = 128   # f32 lane-tile width
SUB = 8      # f32 sublane-tile height


def _round_up(x, m):
    return ((x + m - 1) // m) * m


def decoder_kernel(ids_ref, h_ref, enc_ref, wencb_ref, wbig_ref, bbig_ref,
                   wdec_ref, bfc_ref, out_ref, hid_ref):
    """One S-tile of: fused embedding + GRU single step + relu(concat) + linear(2H -> 1).

    ids_ref   : SMEM (B,)          int32 token ids
    h_ref     : (B, 128)           prev hidden, lanes [H:] zero
    enc_ref   : (B, S_tile, H)     natural-layout enc_out block (f32 or bf16)
    wencb_ref : (B, 1, H)          w_fc[:, :H] replicated per batch row (enc dtype)
    wbig_ref  : (256, 512)         fused GRU weight; rows [0:V] = Emb @ W_ih (per token),
                                   rows [128:128+H] = W_hh; 128-lane gate tiles:
                                   [r_combined | z_combined | n_input | n_hidden]
    bbig_ref  : (1, 512)           fused gate biases (same tile layout)
    wdec_ref  : (1, 128)           w_fc[:, H:] on lanes [:H], zero beyond
    bfc_ref   : SMEM (1,)          fc bias
    out_ref   : (B, 1, S_tile)     fc result for this S tile (S lane-dense)
    hid_ref   : (B, 128)           new hidden (aliased with h_ref's HBM buffer)
    """
    B = h_ref.shape[0]
    lane = h_ref.shape[1]                       # 128

    # ---- GRU single step (tiny; recomputed each grid step -> steps are stateless) ----
    # embedding lookup as a one-hot row select (exact: vocab <= 128, asserted on pack)
    lane_iota = jax.lax.broadcasted_iota(jnp.int32, (1, lane), 1)
    onehot = jnp.concatenate(
        [(lane_iota == ids_ref[b]).astype(jnp.float32) for b in range(B)], axis=0)

    h_prev = h_ref[...]                                               # (B, 128)
    g = (jnp.dot(onehot, wbig_ref[0:lane, :],
                 preferred_element_type=jnp.float32)
         + jnp.dot(h_prev, wbig_ref[lane:2 * lane, :],
                   preferred_element_type=jnp.float32)
         + bbig_ref[...])                                             # (B, 512)

    # gate tiles are 128-lane aligned -> free vreg selects
    r = jax.nn.sigmoid(g[:, 0 * lane:1 * lane])
    z = jax.nn.sigmoid(g[:, 1 * lane:2 * lane])
    n = jnp.tanh(g[:, 2 * lane:3 * lane] + r * g[:, 3 * lane:4 * lane])
    h_new = (1.0 - z) * n + z * h_prev                                # padded lanes stay 0
    hid_ref[...] = h_new

    # decoder-side fc term: relu(h_new) . w_dec + b_fc  (VPU mul + XLU lane reduce)
    dec = jnp.sum(jnp.maximum(h_new, 0.0) * wdec_ref[...],
                  axis=-1, keepdims=True)                             # (B, 1)
    const = (dec + bfc_ref[0])[:, None, :]                            # (B, 1, 1)

    # ---- encoder-side fc term for this S tile: relu(enc) . w_enc via batched MXU dot ----
    enc_relu = jnp.maximum(enc_ref[...], 0).astype(wencb_ref.dtype)   # (B, S_tile, H)
    part = jnp.einsum('bqh,bsh->bqs', wencb_ref[...], enc_relu,
                      preferred_element_type=jnp.float32)             # (B, 1, S_tile)

    out_ref[...] = part + const


def pack_params(raw):
    """Fold embedding into W_ih, lay gates out on 128-lane tiles, split the fc weight."""
    emb = raw["embedding"].astype(jnp.float32)           # (V, E)
    w_ih_t = raw["w_ih"].T.astype(jnp.float32)           # (E, 3H), gate order r,z,n
    w_hh_t = raw["w_hh"].T.astype(jnp.float32)           # (H, 3H)
    b_ih = raw["b_ih"].astype(jnp.float32)               # (3H,)
    b_hh = raw["b_hh"].astype(jnp.float32)               # (3H,)
    V = emb.shape[0]
    H = w_hh_t.shape[0]
    assert V <= LANE and H <= LANE, "vocab and hidden must fit in one 128-lane tile"

    ew = emb @ w_ih_t                                    # (V, 3H): per-token gi (no bias)

    w_big = jnp.zeros((2 * LANE, 4 * LANE), jnp.float32)
    # one-hot (token) rows
    w_big = w_big.at[0:V, 0 * LANE:0 * LANE + H].set(ew[:, 0:H])          # gi_r
    w_big = w_big.at[0:V, 1 * LANE:1 * LANE + H].set(ew[:, H:2 * H])      # gi_z
    w_big = w_big.at[0:V, 2 * LANE:2 * LANE + H].set(ew[:, 2 * H:3 * H])  # gi_n
    # hidden rows
    w_big = w_big.at[LANE:LANE + H, 0 * LANE:0 * LANE + H].set(w_hh_t[:, 0:H])          # gh_r
    w_big = w_big.at[LANE:LANE + H, 1 * LANE:1 * LANE + H].set(w_hh_t[:, H:2 * H])      # gh_z
    w_big = w_big.at[LANE:LANE + H, 3 * LANE:3 * LANE + H].set(w_hh_t[:, 2 * H:3 * H])  # gh_n

    b_big = jnp.zeros((1, 4 * LANE), jnp.float32)
    b_big = b_big.at[0, 0 * LANE:0 * LANE + H].set(b_ih[0:H] + b_hh[0:H])
    b_big = b_big.at[0, 1 * LANE:1 * LANE + H].set(b_ih[H:2 * H] + b_hh[H:2 * H])
    b_big = b_big.at[0, 2 * LANE:2 * LANE + H].set(b_ih[2 * H:3 * H])
    b_big = b_big.at[0, 3 * LANE:3 * LANE + H].set(b_hh[2 * H:3 * H])

    w_fc = raw["w_fc"].astype(jnp.float32)               # (1, 2H)
    w_enc = w_fc[:, :H]                                  # (1, H)  -- natural enc lanes
    w_dec = jnp.zeros((1, LANE), jnp.float32).at[0, :H].set(w_fc[0, H:])
    b_fc = raw["b_fc"].reshape(1).astype(jnp.float32)

    return {"w_big": w_big, "b_big": b_big, "w_enc": w_enc,
            "w_dec": w_dec, "b_fc": b_fc}


def decoder_forward(input_ids, prev_hidden, enc_out, packed, *, s_block=512):
    """Wrapper reproducing Decoder.forward (eval mode)."""
    B, H = prev_hidden.shape
    S = enc_out.shape[1]
    assert enc_out.shape[0] == B and enc_out.shape[2] == H, \
        "fc_out(2H->1) requires enc_hid_dim == dec_hid_dim"

    # S tiling: one tile if S is small, otherwise 512-row tiles streamed by the grid.
    if S <= s_block:
        s_tile = _round_up(S, SUB)
    else:
        s_tile = s_block
    s_pad = _round_up(S, s_tile)

    # tiny layout plumbing only: ids->int32, hidden lanes padded to 128,
    # enc padded along S only when needed (never transposed, never lane-padded).
    ids = input_ids.astype(jnp.int32)                                          # (B,)
    h_pad = jnp.zeros((B, LANE), jnp.float32).at[:, :H].set(
        prev_hidden.astype(jnp.float32))
    enc_p = enc_out if s_pad == S else jnp.pad(enc_out, ((0, 0), (0, s_pad - S), (0, 0)))
    w_enc_b = jnp.broadcast_to(packed["w_enc"][None, :, :], (B, 1, H)).astype(enc_p.dtype)

    grid = (s_pad // s_tile,)
    smem = pl.BlockSpec(memory_space=pltpu.MemorySpace.SMEM)

    out_pad, hid_pad = pl.pallas_call(
        decoder_kernel,
        grid=grid,
        in_specs=[
            smem,                                                  # ids       (SMEM)
            pl.BlockSpec((B, LANE), lambda s: (0, 0)),             # prev hidden (resident)
            pl.BlockSpec((B, s_tile, H), lambda s: (0, s, 0)),     # enc block  (streamed)
            pl.BlockSpec((B, 1, H), lambda s: (0, 0, 0)),          # w_enc rows (resident)
            pl.BlockSpec((2 * LANE, 4 * LANE), lambda s: (0, 0)),  # w_big      (resident)
            pl.BlockSpec((1, 4 * LANE), lambda s: (0, 0)),         # b_big      (resident)
            pl.BlockSpec((1, LANE), lambda s: (0, 0)),             # w_dec      (resident)
            smem,                                                  # b_fc       (SMEM)
        ],
        out_specs=(
            pl.BlockSpec((B, 1, s_tile), lambda s: (0, 0, s)),     # out block (S on lanes)
            pl.BlockSpec((B, LANE), lambda s: (0, 0)),             # hidden    (resident)
        ),
        out_shape=(jax.ShapeDtypeStruct((B, 1, s_pad), jnp.float32),
                   jax.ShapeDtypeStruct((B, LANE), jnp.float32)),
        input_output_aliases={1: 1},   # reuse prev_hidden's buffer for the new hidden
        # NOTE: grid steps are stateless (GRU recomputed per step), but the hidden output
        # is not partitioned along S, so keep the axis "arbitrary" for portability.
        compiler_params=pltpu.CompilerParams(dimension_semantics=("arbitrary",)),
    )(ids, h_pad, enc_p, w_enc_b,
      packed["w_big"], packed["b_big"], packed["w_dec"], packed["b_fc"])

    out = out_pad[:, 0, :S][..., None]                   # (B, S, 1)
    hidden = hid_pad[:, :H]                              # (B, H)
    return out, hidden


def reference_forward(input_ids, prev_hidden, enc_out, raw):
    """Pure-JAX reference (same math as the PyTorch module in eval mode)."""
    x = raw["embedding"][input_ids].astype(jnp.float32)
    H = prev_hidden.shape[1]
    gi = x @ raw["w_ih"].T + raw["b_ih"]
    gh = prev_hidden @ raw["w_hh"].T + raw["b_hh"]
    r = jax.nn.sigmoid(gi[:, :H] + gh[:, :H])
    z = jax.nn.sigmoid(gi[:, H:2 * H] + gh[:, H:2 * H])
    n = jnp.tanh(gi[:, 2 * H:] + r * gh[:, 2 * H:])
    h_new = (1.0 - z) * n + z * prev_hidden
    S = enc_out.shape[1]
    rep = jnp.broadcast_to(h_new[:, None, :], (h_new.shape[0], S, H))
    cat = jax.nn.relu(jnp.concatenate([enc_out, rep], axis=-1))   # (B, S, 2H)
    out = cat @ raw["w_fc"].T + raw["b_fc"]                       # (B, S, 1)
    return out, h_new


def init_params(key, vocab, embedding_dim, dec_hid_dim):
    """Raw parameters in PyTorch nn.GRU / nn.Linear layout (gate order r, z, n)."""
    E, H = embedding_dim, dec_hid_dim
    ks = jax.random.split(key, 7)
    k_gru = 1.0 / jnp.sqrt(H)
    k_fc = 1.0 / jnp.sqrt(2.0 * H)
    u = lambda k, shp, s: jax.random.uniform(k, shp, jnp.float32, -s, s)
    return {
        "embedding": jax.random.normal(ks[0], (vocab, E), jnp.float32),
        "w_ih": u(ks[1], (3 * H, E), k_gru),
        "w_hh": u(ks[2], (3 * H, H), k_gru),
        "b_ih": u(ks[3], (3 * H,), k_gru),
        "b_hh": u(ks[4], (3 * H,), k_gru),
        "w_fc": u(ks[5], (1, 2 * H), k_fc),
        "b_fc": u(ks[6], (1,), k_fc),
    }


if __name__ == "__main__":
    B, S = 2, 8
    VOCAB, E, H = 16, 32, 32       # embedding_dim=32, enc_hid_dim=dec_hid_dim=32

    key = jax.random.PRNGKey(0)
    k_p, k_in, k_h, k_enc = jax.random.split(key, 4)

    raw = init_params(k_p, VOCAB, E, H)
    packed = pack_params(raw)

    input_ids = jax.random.randint(k_in, (B,), 0, VOCAB)
    prev_hidden = jax.random.normal(k_h, (B, H), jnp.float32)
    enc_out = jax.random.normal(k_enc, (B, S, H), jnp.float32)

    fwd = jax.jit(decoder_forward)
    out, hidden = fwd(input_ids, prev_hidden, enc_out, packed)
    jax.block_until_ready((out, hidden))

    ref_out, ref_hidden = reference_forward(input_ids, prev_hidden, enc_out, raw)
    assert out.shape == (B, S, 1) and hidden.shape == (B, H)
    assert jnp.allclose(out, ref_out, atol=1e-4, rtol=1e-4)
    assert jnp.allclose(hidden, ref_hidden, atol=1e-4, rtol=1e-4)

    print("KERNEL_OK")
</pallas_src>

<mosaic_0001>
module attributes {stable_mosaic.version = 11 : i64} {
  func.func @decoder_kernel(%arg0: i32, %arg1: memref<2xi32, #tpu.memory_space<smem>>, %arg2: memref<2x128xf32, #tpu.memory_space<vmem>>, %arg3: memref<2x8x32xf32, #tpu.memory_space<vmem>>, %arg4: memref<2x1x32xf32, #tpu.memory_space<vmem>>, %arg5: memref<256x512xf32, #tpu.memory_space<vmem>>, %arg6: memref<1x512xf32, #tpu.memory_space<vmem>>, %arg7: memref<1x128xf32, #tpu.memory_space<vmem>>, %arg8: memref<1xf32, #tpu.memory_space<smem>>, %arg9: memref<2x1x8xf32, #tpu.memory_space<vmem>>, %arg10: memref<2x128xf32, #tpu.memory_space<vmem>>) attributes {dimension_semantics = [#tpu.dimension_semantics<arbitrary>], iteration_bounds = array<i64: 1>, scalar_prefetch = 0 : i64, scratch_operands = 0 : i64, tpu.core_type = #tpu.core_type<tc>, window_params = [{transform_indices = @transform_0, window_bounds = array<i64: 2>}, {pipeline_mode = #tpu.pipeline_mode<synchronous>, transform_indices = @transform_1, window_bounds = array<i64: 2, 128>}, {transform_indices = @transform_2, window_bounds = array<i64: 2, 8, 32>}, {pipeline_mode = #tpu.pipeline_mode<synchronous>, transform_indices = @transform_3, window_bounds = array<i64: 2, 1, 32>}, {pipeline_mode = #tpu.pipeline_mode<synchronous>, transform_indices = @transform_4, window_bounds = array<i64: 256, 512>}, {pipeline_mode = #tpu.pipeline_mode<synchronous>, transform_indices = @transform_5, window_bounds = array<i64: 1, 512>}, {pipeline_mode = #tpu.pipeline_mode<synchronous>, transform_indices = @transform_6, window_bounds = array<i64: 1, 128>}, {transform_indices = @transform_7, window_bounds = array<i64: 1>}, {transform_indices = @transform_8, window_bounds = array<i64: 2, 1, 8>}, {pipeline_mode = #tpu.pipeline_mode<synchronous>, transform_indices = @transform_9, window_bounds = array<i64: 2, 128>}]} {
    %0 = tpu.iota {dimensions = array<i32: 1>} : vector<1x128xi32>
    %c0 = arith.constant 0 : index
    %1 = memref.load %arg1[%c0] : memref<2xi32, #tpu.memory_space<smem>>
    %2 = vector.broadcast %1 : i32 to vector<1x128xi32>
    %3 = arith.cmpi eq, %0, %2 : vector<1x128xi32>
    %4 = arith.extui %3 : vector<1x128xi1> to vector<1x128xi32>
    %5 = arith.sitofp %4 : vector<1x128xi32> to vector<1x128xf32>
    %c1 = arith.constant 1 : index
    %6 = memref.load %arg1[%c1] : memref<2xi32, #tpu.memory_space<smem>>
    %7 = vector.broadcast %6 : i32 to vector<1x128xi32>
    %8 = arith.cmpi eq, %0, %7 : vector<1x128xi32>
    %9 = arith.extui %8 : vector<1x128xi1> to vector<1x128xi32>
    %10 = arith.sitofp %9 : vector<1x128xi32> to vector<1x128xf32>
    %11 = tpu.concatenate %5, %10 in 0 : vector<1x128xf32>, vector<1x128xf32> -> vector<2x128xf32>
    %c0_0 = arith.constant 0 : index
    %c0_1 = arith.constant 0 : index
    %12 = vector.load %arg2[%c0_0, %c0_1] : memref<2x128xf32, #tpu.memory_space<vmem>>, vector<2x128xf32>
    %c0_2 = arith.constant 0 : index
    %c0_3 = arith.constant 0 : index
    %13 = vector.load %arg5[%c0_2, %c0_3] : memref<256x512xf32, #tpu.memory_space<vmem>>, vector<128x512xf32>
    %cst = arith.constant dense<0.000000e+00> : vector<2x512xf32>
    %14 = tpu.matmul %11, %13, %cst {dimension_numbers = #tpu.dot_dimension_numbers<[1], [0], [0], [1], [0, 0, 1, 1], [], []>} : vector<2x128xf32>, vector<128x512xf32>, vector<2x512xf32> -> vector<2x512xf32>
    %c128 = arith.constant 128 : index
    %c0_4 = arith.constant 0 : index
    %15 = vector.load %arg5[%c128, %c0_4] : memref<256x512xf32, #tpu.memory_space<vmem>>, vector<128x512xf32>
    %cst_5 = arith.constant dense<0.000000e+00> : vector<2x512xf32>
    %16 = tpu.matmul %12, %15, %cst_5 {dimension_numbers = #tpu.dot_dimension_numbers<[1], [0], [0], [1], [0, 0, 1, 1], [], []>} : vector<2x128xf32>, vector<128x512xf32>, vector<2x512xf32> -> vector<2x512xf32>
    %17 = arith.addf %14, %16 : vector<2x512xf32>
    %c0_6 = arith.constant 0 : index
    %c0_7 = arith.constant 0 : index
    %18 = vector.load %arg6[%c0_6, %c0_7] : memref<1x512xf32, #tpu.memory_space<vmem>>, vector<1x512xf32>
    %19 = vector.broadcast %18 : vector<1x512xf32> to vector<2x512xf32>
    %20 = arith.addf %17, %19 : vector<2x512xf32>
    %21 = vector.extract_strided_slice %20 {offsets = [0, 0], sizes = [2, 128], strides = [1, 1]} : vector<2x512xf32> to vector<2x128xf32>
    %22 = arith.negf %21 : vector<2x128xf32>
    %23 = math.exp %22 : vector<2x128xf32>
    %cst_8 = arith.constant 1.000000e+00 : f32
    %24 = vector.broadcast %cst_8 : f32 to vector<2x128xf32>
    %25 = arith.addf %24, %23 : vector<2x128xf32>
    %26 = arith.divf %24, %25 : vector<2x128xf32>
    %27 = vector.extract_strided_slice %20 {offsets = [0, 128], sizes = [2, 128], strides = [1, 1]} : vector<2x512xf32> to vector<2x128xf32>
    %28 = arith.negf %27 : vector<2x128xf32>
    %29 = math.exp %28 : vector<2x128xf32>
    %cst_9 = arith.constant 1.000000e+00 : f32
    %30 = vector.broadcast %cst_9 : f32 to vector<2x128xf32>
    %31 = arith.addf %30, %29 : vector<2x128xf32>
    %32 = arith.divf %30, %31 : vector<2x128xf32>
    %33 = vector.extract_strided_slice %20 {offsets = [0, 256], sizes = [2, 128], strides = [1, 1]} : vector<2x512xf32> to vector<2x128xf32>
    %34 = vector.extract_strided_slice %20 {offsets = [0, 384], sizes = [2, 128], strides = [1, 1]} : vector<2x512xf32> to vector<2x128xf32>
    %35 = arith.mulf %26, %34 : vector<2x128xf32>
    %36 = arith.addf %33, %35 : vector<2x128xf32>
    %37 = math.tanh %36 : vector<2x128xf32>
    %cst_10 = arith.constant 1.000000e+00 : f32
    %38 = vector.broadcast %cst_10 : f32 to vector<2x128xf32>
    %39 = arith.subf %38, %32 : vector<2x128xf32>
    %40 = arith.mulf %39, %37 : vector<2x128xf32>
    %41 = arith.mulf %32, %12 : vector<2x128xf32>
    %42 = arith.addf %40, %41 : vector<2x128xf32>
    %c0_11 = arith.constant 0 : index
    %c0_12 = arith.constant 0 : index
    %43 = vector.load %arg10[%c0_11, %c0_12] : memref<2x128xf32, #tpu.memory_space<vmem>>, vector<2x128xf32>
    tpu.vector_store %arg10[%c0_11, %c0_12], %42 {strides = array<i32>} : memref<2x128xf32, #tpu.memory_space<vmem>>, vector<2x128xf32>,
    %cst_13 = arith.constant 0.000000e+00 : f32
    %44 = vector.broadcast %cst_13 : f32 to vector<2x128xf32>
    %45 = arith.maximumf %42, %44 : vector<2x128xf32>
    %c0_14 = arith.constant 0 : index
    %c0_15 = arith.constant 0 : index
    %46 = vector.load %arg7[%c0_14, %c0_15] : memref<1x128xf32, #tpu.memory_space<vmem>>, vector<1x128xf32>
    %47 = vector.broadcast %46 : vector<1x128xf32> to vector<2x128xf32>
    %48 = arith.mulf %45, %47 : vector<2x128xf32>
    %cst_16 = arith.constant dense<0.000000e+00> : vector<2xf32>
    %49 = vector.multi_reduction <add>, %48, %cst_16 [1] : vector<2x128xf32> to vector<2xf32>
    %50 = vector.shape_cast %49 : vector<2xf32> to vector<2x1xf32>
    %c0_17 = arith.constant 0 : index
    %51 = memref.load %arg8[%c0_17] : memref<1xf32, #tpu.memory_space<smem>>
    %52 = vector.broadcast %51 : f32 to vector<2x1xf32>
    %53 = arith.addf %50, %52 : vector<2x1xf32>
    %54 = vector.shape_cast %53 : vector<2x1xf32> to vector<2x1x1xf32>
    %c0_18 = arith.constant 0 : index
    %c0_19 = arith.constant 0 : index
    %c0_20 = arith.constant 0 : index
    %55 = vector.load %arg3[%c0_18, %c0_19, %c0_20] : memref<2x8x32xf32, #tpu.memory_space<vmem>>, vector<2x8x32xf32>
    %cst_21 = arith.constant 0.000000e+00 : f32
    %56 = vector.broadcast %cst_21 : f32 to vector<2x8x32xf32>
    %57 = arith.maximumf %55, %56 : vector<2x8x32xf32>
    %c0_22 = arith.constant 0 : index
    %c0_23 = arith.constant 0 : index
    %c0_24 = arith.constant 0 : index
    %58 = vector.load %arg4[%c0_22, %c0_23, %c0_24] : memref<2x1x32xf32, #tpu.memory_space<vmem>>, vector<2x1x32xf32>
    "tpu.trace_start"() <{level = 10 : i32, message = "bqh,bsh->bqs"}> : () -> ()
    %cst_25 = arith.constant dense<0.000000e+00> : vector<2x1x8xf32>
    %59 = tpu.matmul %58, %57, %cst_25 {dimension_numbers = #tpu.dot_dimension_numbers<[2], [2], [1], [1], [0, 0, 0, 1, 1, 1], [0], [0]>} : vector<2x1x32xf32>, vector<2x8x32xf32>, vector<2x1x8xf32> -> vector<2x1x8xf32>
    "tpu.trace_stop"() : () -> ()
    %60 = vector.broadcast %54 : vector<2x1x1xf32> to vector<2x1x8xf32>
    %61 = arith.addf %59, %60 : vector<2x1x8xf32>
    %c0_26 = arith.constant 0 : index
    %c0_27 = arith.constant 0 : index
    %c0_28 = arith.constant 0 : index
    %62 = vector.load %arg9[%c0_26, %c0_27, %c0_28] : memref<2x1x8xf32, #tpu.memory_space<vmem>>, vector<2x1x8xf32>
    tpu.vector_store %arg9[%c0_26, %c0_27, %c0_28], %61 {strides = array<i32>} : memref<2x1x8xf32, #tpu.memory_space<vmem>>, vector<2x1x8xf32>,
    return
  }
  func.func @transform_0(%arg0: i32) -> i32 {
    %c0_i32 = arith.constant 0 : i32
    %c0_i32_0 = arith.constant 0 : i32
    return %c0_i32 : i32
  }
  func.func @transform_1(%arg0: i32) -> (i32, i32) {
    %c0_i32 = arith.constant 0 : i32
    %c0_i32_0 = arith.constant 0 : i32
    %c0_i32_1 = arith.constant 0 : i32
    return %c0_i32, %c0_i32_0 : i32, i32
  }
  func.func @transform_2(%arg0: i32) -> (i32, i32, i32) {
    %c0_i32 = arith.constant 0 : i32
    %c0_i32_0 = arith.constant 0 : i32
    %c0_i32_1 = arith.constant 0 : i32
    return %c0_i32, %arg0, %c0_i32_0 : i32, i32, i32
  }
  func.func @transform_3(%arg0: i32) -> (i32, i32, i32) {
    %c0_i32 = arith.constant 0 : i32
    %c0_i32_0 = arith.constant 0 : i32
    %c0_i32_1 = arith.constant 0 : i32
    %c0_i32_2 = arith.constant 0 : i32
    return %c0_i32, %c0_i32_0, %c0_i32_1 : i32, i32, i32
  }
  func.func @transform_4(%arg0: i32) -> (i32, i32) {
    %c0_i32 = arith.constant 0 : i32
    %c0_i32_0 = arith.constant 0 : i32
    %c0_i32_1 = arith.constant 0 : i32
    return %c0_i32, %c0_i32_0 : i32, i32
  }
  func.func @transform_5(%arg0: i32) -> (i32, i32) {
    %c0_i32 = arith.constant 0 : i32
    %c0_i32_0 = arith.constant 0 : i32
    %c0_i32_1 = arith.constant 0 : i32
    return %c0_i32, %c0_i32_0 : i32, i32
  }
  func.func @transform_6(%arg0: i32) -> (i32, i32) {
    %c0_i32 = arith.constant 0 : i32
    %c0_i32_0 = arith.constant 0 : i32
    %c0_i32_1 = arith.constant 0 : i32
    return %c0_i32, %c0_i32_0 : i32, i32
  }
  func.func @transform_7(%arg0: i32) -> i32 {
    %c0_i32 = arith.constant 0 : i32
    %c0_i32_0 = arith.constant 0 : i32
    return %c0_i32 : i32
  }
  func.func @transform_8(%arg0: i32) -> (i32, i32, i32) {
    %c0_i32 = arith.constant 0 : i32
    %c0_i32_0 = arith.constant 0 : i32
    %c0_i32_1 = arith.constant 0 : i32
    return %c0_i32, %c0_i32_0, %arg0 : i32, i32, i32
  }
  func.func @transform_9(%arg0: i32) -> (i32, i32) {
    %c0_i32 = arith.constant 0 : i32
    %c0_i32_0 = arith.constant 0 : i32
    %c0_i32_1 = arith.constant 0 : i32
    return %c0_i32, %c0_i32_0 : i32, i32
  }
}

</mosaic_0001>

<bundles_post_ra>
// kernel: decoder_forward.1
= control target key start
LH: loop header
LB: loop body
LE: loop exit
PB: predicated region body
PF: predicated region fallthrough
CT: control target
= control target key end

     0   :  { %16 = vsyncpa [#allocation6], 0  ;;  %s1117_s0 = inlined_call_operand.vmem [shape: s32[2], index: 0, kind: input, shape index: {}]   ;;  %s1118_s1 = inlined_call_operand.vmem [shape: f32[2,128], index: 1, kind: input, shape index: {}, may-alias: {1,9}]   ;;  %s1119_s2 = inlined_call_operand.vmem [shape: f32[2,8,32], index: 2, kind: input, shape index: {}]   ;;  %s1120_s3 = inlined_call_operand.vmem [shape: f32[2,1,32], index: 3, kind: input, shape index: {}]   ;;  %s1121_s4 = inlined_call_operand.hbm [shape: f32[256,512], index: 4, kind: input, shape index: {}]   ;;  %s1122_s5 = inlined_call_operand.vmem [shape: f32[1,512], index: 5, kind: input, shape index: {}]   ;;  %s1123_s6 = inlined_call_operand.vmem [shape: f32[1,128], index: 6, kind: input, shape index: {}]   ;;  %s1124_s7 = inlined_call_operand.<no memory space> [shape: f32[1], index: 7, kind: input, shape index: {}]   ;;  %s1125_s8 = inlined_call_operand.hbm [shape: f32[2,1,8], index: 8, kind: output, shape index: {0}]   ;;  %s1126_s9 = inlined_call_operand.vmem [shape: f32[2,128], index: 9, kind: output, shape index: {1}, may-alias: {1,9}]  }
   0x1   :  { %17 = vsyncpa [#allocation4], 0 }
   0x2   :  { %18 = vsyncpa [#allocation5], 0  ;;  %s25_s11 = sshll.u32 %s1117_s0, 4  ;;  %s26_s11 = int_to_ptr.vmem [resolvable:$true] %s25_s11 }
   0x3   :  { %s919_s12 = scalar_lea.vmem %s26_s11, 16  ;;  %p924_p1 = scmp.lt.s32.totalorder %s26_s11, %s26_s11 }
   0x4   :  { %p920_p0 = scmp.ne.s32.totalorder %s26_s11, %s919_s12  ;;  %p925_p2 = scmp.lt.s32.totalorder %s919_s12, %s919_s12 }
   0x6   :  { %p926_p3 = por %p925_p2, %p924_p1 }
   0x8   :  { %p927_p4 = pnand %p926_p3, %p920_p0 }
   0xa   :  { %930 = shalt.err (!%p927_p4)
}
   0xb   :  { %s981_s13 = smov [#allocation3]   ;;  %s982_s14 = smov [#allocation7]  }
   0xc   :  { %28 = dma.vmem_to_smem %s26_s11, 16, %s981_s13, [#allocation6]  }
   0xd   :  { %s40_s15 = sshll.u32 %s982_s14, 4  ;;  %s931_s18 = scalar_lea.hbm %s1121_s4, 16384  ;;  %s41_s15 = int_to_ptr.vmem [resolvable:$true] %s40_s15 }
   0xe   :  { %p932_p5 = scmp.ne.s32.totalorder %s1121_s4, %s931_s18  ;;  %p935_p6 = scmp.lt.u32.totalorder %s931_s18, %s1121_s4 }
  0x10   :  { %p937_p7 = pnand %p935_p6, %p932_p5 }
  0x12   :  { %940 = shalt.err (!%p937_p7)
}
  0x13   :  { %s941_s22 = scalar_lea.vmem %s41_s15, 16384  ;;  %p946_p9 = scmp.lt.s32.totalorder %s41_s15, %s41_s15 }
  0x14   :  { %p942_p8 = scmp.ne.s32.totalorder %s41_s15, %s941_s22  ;;  %p947_p10 = scmp.lt.s32.totalorder %s941_s22, %s941_s22 }
  0x16   :  { %p948_p11 = por %p947_p10, %p946_p9 }
  0x18   :  { %p949_p12 = pnand %p948_p11, %p942_p8 }
  0x1a   :  { %952 = shalt.err (!%p949_p12)
}
  0x1b   :  { %s983_s23 = smov 512   ;;  %s984_s24 = smov 32  }
  0x1c   :  { %46 = dma.hbm_to_vmem [thread:$0]  %s1121_s4, 16384, %s41_s15, [#allocation4], %s983_s23, %s983_s23, %s984_s24  }
  0x1d   :  { %975 = dma.done.wait [#allocation6], 16  }
  0x1e   :  { %976 = vsyncadd [#allocation6], 4294967280 }
  0x1f   :  { %977 = dma.done.wait [#allocation4], 16384  }
  0x20   :  { %978 = vsyncadd [#allocation4], 4294950912 }
  0x21   :  { %59 = sfence }
  0x22   :  { %v140_v0 = vld [vmem:[#allocation7 + $0x208] sm:$0xff]  ;;  %v142_v2 = vld [vmem:[#allocation7 + $0x218] sm:$0xff]  ;;  %v139_v5 = vld [vmem:[#allocation7 + $0x200] sm:$0xff]  ;;  %v985_v7 = vmov 0.0   ;;  %s1068_s28 = sld [smem:[#allocation3 + $0x1]]  ;;  %vm72_vm2 = vcmask 1040384  }
  0x23   :  { %v144_v1 = vld [vmem:[#allocation7 + $0x228] sm:$0xff]  ;;  %v146_v4 = vld [vmem:[#allocation7 + $0x238] sm:$0xff]  ;;  %v143_v6 = vld [vmem:[#allocation7 + $0x220] sm:$0xff]  ;;  %267 = vmatprep.mubr.f32.mxu0 %v985_v7  ;;  %338 = vmatprep.mubr.f32.mxu1 %v985_v7  ;;  %vm986_vm3 = vmmov 0   ;;  %vm566_vm4 = vcmask 261120   ;;  %vm542_vm5 = vcmask 1041408  }
  0x24   :  { %v768_v3 = vpack.c.bf16 %v144_v1, %v140_v0  ;;  %v800_v8 = vpack.c.bf16 %v146_v4, %v142_v2  ;;  %v770_v9 = vpack.c.bf16 %v143_v6, %v139_v5  ;;  %v141_v10 = vld [vmem:[#allocation7 + $0x210] sm:$0xff]  ;;  %v148_v12 = vld [vmem:[#allocation7 + $0x248] sm:$0xff]  ;;  %v150_v15 = vld [vmem:[#allocation7 + $0x258] sm:$0xff]  ;;  %vm719_vm6 = vcmask 57344  }
  0x25   :  { %v145_v11 = vld [vmem:[#allocation7 + $0x230] sm:$0xff]  ;;  %v152_v14 = vld [vmem:[#allocation7 + $0x268] sm:$0xff]  ;;  %v154_v16 = vld [vmem:[#allocation7 + $0x278] sm:$0xff] }
  0x26   :  { %769 = vmatprep.subr.bf16.mxu0 %v768_v3  ;;  %v802_v13 = vpack.c.bf16 %v145_v11, %v141_v10  ;;  %801 = vmatprep.subr.bf16.mxu1 %v800_v8  ;;  %v772_v17 = vpack.c.bf16 %v152_v14, %v148_v12  ;;  %v804_v18 = vpack.c.bf16 %v154_v16, %v150_v15  ;;  %v147_v19 = vld [vmem:[#allocation7 + $0x240] sm:$0xff]  ;;  %v149_v21 = vld [vmem:[#allocation7 + $0x250] sm:$0xff]  ;;  %v156_v24 = vld [vmem:[#allocation7 + $0x288] sm:$0xff] }
  0x27   :  { %771 = vmatpush1.bf16.msra.mxu0 %v770_v9  ;;  %v151_v20 = vld [vmem:[#allocation7 + $0x260] sm:$0xff]  ;;  %v153_v23 = vld [vmem:[#allocation7 + $0x270] sm:$0xff]  ;;  %v160_v25 = vld [vmem:[#allocation7 + $0x2a8] sm:$0xff] }
  0x28   :  { %803 = vmatpush1.bf16.msra.mxu1 %v802_v13  ;;  %v774_v22 = vpack.c.bf16 %v151_v20, %v147_v19  ;;  %773 = vmatprep.subr.bf16.mxu0 %v772_v17  ;;  %v806_v26 = vpack.c.bf16 %v153_v23, %v149_v21  ;;  %v776_v27 = vpack.c.bf16 %v160_v25, %v156_v24  ;;  %v158_v28 = vld [vmem:[#allocation7 + $0x298] sm:$0xff]  ;;  %v155_v30 = vld [vmem:[#allocation7 + $0x280] sm:$0xff]  ;;  %v157_v33 = vld [vmem:[#allocation7 + $0x290] sm:$0xff] }
  0x29   :  { %805 = vmatprep.subr.bf16.mxu1 %v804_v18  ;;  %v162_v29 = vld [vmem:[#allocation7 + $0x2b8] sm:$0xff]  ;;  %v159_v32 = vld [vmem:[#allocation7 + $0x2a0] sm:$0xff]  ;;  %v161_v34 = vld [vmem:[#allocation7 + $0x2b0] sm:$0xff] }
  0x2a   :  { %v808_v31 = vpack.c.bf16 %v162_v29, %v158_v28  ;;  %v778_v35 = vpack.c.bf16 %v159_v32, %v155_v30  ;;  %v164_v36 = vld [vmem:[#allocation7 + $0x2c8] sm:$0xff]  ;;  %v166_v38 = vld [vmem:[#allocation7 + $0x2d8] sm:$0xff]  ;;  %v810_v39 = vpack.c.bf16 %v161_v34, %v157_v33  ;;  %v163_v42 = vld [vmem:[#allocation7 + $0x2c0] sm:$0xff] }
  0x2b   :  { %775 = vmatpush1.bf16.msra.mxu0 %v774_v22  ;;  %v168_v37 = vld [vmem:[#allocation7 + $0x2e8] sm:$0xff]  ;;  %v170_v41 = vld [vmem:[#allocation7 + $0x2f8] sm:$0xff]  ;;  %v167_v43 = vld [vmem:[#allocation7 + $0x2e0] sm:$0xff] }
  0x2c   :  { %807 = vmatpush1.bf16.msra.mxu1 %v806_v26  ;;  %777 = vmatprep.subr.bf16.mxu0 %v776_v27  ;;  %v780_v40 = vpack.c.bf16 %v168_v37, %v164_v36  ;;  %v812_v44 = vpack.c.bf16 %v170_v41, %v166_v38  ;;  %v165_v45 = vld [vmem:[#allocation7 + $0x2d0] sm:$0xff]  ;;  %v172_v47 = vld [vmem:[#allocation7 + $0x308] sm:$0xff]  ;;  %v174_v49 = vld [vmem:[#allocation7 + $0x318] sm:$0xff]  ;;  %v782_v51 = vpack.c.bf16 %v167_v43, %v163_v42 }
  0x2d   :  { %809 = vmatprep.subr.bf16.mxu1 %v808_v31  ;;  %v169_v46 = vld [vmem:[#allocation7 + $0x2f0] sm:$0xff]  ;;  %v176_v48 = vld [vmem:[#allocation7 + $0x328] sm:$0xff]  ;;  %v178_v50 = vld [vmem:[#allocation7 + $0x338] sm:$0xff] }
  0x2e   :  { %v814_v52 = vpack.c.bf16 %v169_v46, %v165_v45  ;;  %v784_v53 = vpack.c.bf16 %v176_v48, %v172_v47  ;;  %v171_v54 = vld [vmem:[#allocation7 + $0x300] sm:$0xff]  ;;  %v173_v56 = vld [vmem:[#allocation7 + $0x310] sm:$0xff]  ;;  %v816_v57 = vpack.c.bf16 %v178_v50, %v174_v49  ;;  %v180_v59 = vld [vmem:[#allocation7 + $0x348] sm:$0xff] }
  0x2f   :  { %779 = vmatpush1.bf16.msra.mxu0 %v778_v35  ;;  %v175_v55 = vld [vmem:[#allocation7 + $0x320] sm:$0xff]  ;;  %v177_v58 = vld [vmem:[#allocation7 + $0x330] sm:$0xff]  ;;  %v184_v60 = vld [vmem:[#allocation7 + $0x368] sm:$0xff] }
  0x30   :  { %811 = vmatpush1.bf16.msra.mxu1 %v810_v39  ;;  %781 = vmatprep.subr.bf16.mxu0 %v780_v40  ;;  %v182_v61 = vld [vmem:[#allocation7 + $0x358] sm:$0xff]  ;;  %v786_v63 = vpack.c.bf16 %v175_v55, %v171_v54  ;;  %v818_v0 = vpack.c.bf16 %v177_v58, %v173_v56  ;;  %v788_v1 = vpack.c.bf16 %v184_v60, %v180_v59  ;;  %v179_v2 = vld [vmem:[#allocation7 + $0x340] sm:$0xff]  ;;  %v181_v4 = vld [vmem:[#allocation7 + $0x350] sm:$0xff] }
  0x31   :  { %813 = vmatprep.subr.bf16.mxu1 %v812_v44  ;;  %v186_v62 = vld [vmem:[#allocation7 + $0x378] sm:$0xff]  ;;  %v183_v3 = vld [vmem:[#allocation7 + $0x360] sm:$0xff]  ;;  %v185_v6 = vld [vmem:[#allocation7 + $0x370] sm:$0xff] }
  0x32   :  { %v820_v5 = vpack.c.bf16 %v186_v62, %v182_v61  ;;  %v188_v8 = vld [vmem:[#allocation7 + $0x388] sm:$0xff]  ;;  %v190_v10 = vld [vmem:[#allocation7 + $0x398] sm:$0xff]  ;;  %v790_v12 = vpack.c.bf16 %v183_v3, %v179_v2  ;;  %v822_v13 = vpack.c.bf16 %v185_v6, %v181_v4  ;;  %v187_v15 = vld [vmem:[#allocation7 + $0x380] sm:$0xff] }
  0x33   :  { %783 = vmatpush1.bf16.msra.mxu0 %v782_v51  ;;  %v192_v9 = vld [vmem:[#allocation7 + $0x3a8] sm:$0xff]  ;;  %v194_v11 = vld [vmem:[#allocation7 + $0x3b8] sm:$0xff]  ;;  %v191_v16 = vld [vmem:[#allocation7 + $0x3a0] sm:$0xff] }
  0x34   :  { %815 = vmatpush1.bf16.msra.mxu1 %v814_v52  ;;  %785 = vmatprep.subr.bf16.mxu0 %v784_v53  ;;  %v792_v14 = vpack.c.bf16 %v192_v9, %v188_v8  ;;  %v189_v17 = vld [vmem:[#allocation7 + $0x390] sm:$0xff]  ;;  %v824_v18 = vpack.c.bf16 %v194_v11, %v190_v10  ;;  %v196_v20 = vld [vmem:[#allocation7 + $0x3c8] sm:$0xff]  ;;  %v198_v22 = vld [vmem:[#allocation7 + $0x3d8] sm:$0xff]  ;;  %v794_v24 = vpack.c.bf16 %v191_v16, %v187_v15 }
  0x35   :  { %817 = vmatprep.subr.bf16.mxu1 %v816_v57  ;;  %v193_v19 = vld [vmem:[#allocation7 + $0x3b0] sm:$0xff]  ;;  %v200_v21 = vld [vmem:[#allocation7 + $0x3e8] sm:$0xff]  ;;  %v202_v23 = vld [vmem:[#allocation7 + $0x3f8] sm:$0xff] }
  0x36   :  { %v826_v25 = vpack.c.bf16 %v193_v19, %v189_v17  ;;  %v796_v26 = vpack.c.bf16 %v200_v21, %v196_v20  ;;  %v195_v27 = vld [vmem:[#allocation7 + $0x3c0] sm:$0xff]  ;;  %v197_v29 = vld [vmem:[#allocation7 + $0x3d0] sm:$0xff]  ;;  %v828_v30 = vpack.c.bf16 %v202_v23, %v198_v22  ;;  %v76_v32 = vld [vmem:[#allocation7 + $0x8] sm:$0xff] }
  0x37   :  { %787 = vmatpush1.bf16.msra.mxu0 %v786_v63  ;;  %v199_v28 = vld [vmem:[#allocation7 + $0x3e0] sm:$0xff]  ;;  %v201_v31 = vld [vmem:[#allocation7 + $0x3f0] sm:$0xff]  ;;  %v80_v33 = vld [vmem:[#allocation7 + $0x28] sm:$0xff] }
  0x38   :  { %819 = vmatpush1.bf16.msra.mxu1 %v818_v0  ;;  %789 = vmatprep.subr.bf16.mxu0 %v788_v1  ;;  %v78_v34 = vld [vmem:[#allocation7 + $0x18] sm:$0xff]  ;;  %v798_v36 = vpack.c.bf16 %v199_v28, %v195_v27  ;;  %v830_v37 = vpack.c.bf16 %v201_v31, %v197_v29  ;;  %v832_v38 = vpack.c.bf16 %v80_v33, %v76_v32  ;;  %v75_v39 = vld [vmem:[#allocation7] sm:$0xff]  ;;  %v77_v41 = vld [vmem:[#allocation7 + $0x10] sm:$0xff] }
  0x39   :  { %821 = vmatprep.subr.bf16.mxu1 %v820_v5  ;;  %v82_v35 = vld [vmem:[#allocation7 + $0x38] sm:$0xff]  ;;  %v79_v40 = vld [vmem:[#allocation7 + $0x20] sm:$0xff]  ;;  %v81_v43 = vld [vmem:[#allocation7 + $0x30] sm:$0xff] }
  0x3a   :  { %v864_v42 = vpack.c.bf16 %v82_v35, %v78_v34  ;;  %v84_v44 = vld [vmem:[#allocation7 + $0x48] sm:$0xff]  ;;  %v86_v46 = vld [vmem:[#allocation7 + $0x58] sm:$0xff]  ;;  %v1060_v48 = vld [vmem:[%s1118_s1] sm:$0x3]  ;;  %v834_v49 = vpack.c.bf16 %v79_v40, %v75_v39  ;;  %v866_v50 = vpack.c.bf16 %v81_v43, %v77_v41  ;;  %s1066_s1 = sld [smem:[#allocation3]] }
  0x3b   :  { %791 = vmatpush1.bf16.msra.mxu0 %v790_v12  ;;  %v88_v45 = vld [vmem:[#allocation7 + $0x68] sm:$0xff]  ;;  %v90_v47 = vld [vmem:[#allocation7 + $0x78] sm:$0xff]  ;;  %v83_v52 = vld [vmem:[#allocation7 + $0x40] sm:$0xff] }
  0x3c   :  { %823 = vmatpush1.bf16.msra.mxu1 %v822_v13  ;;  %793 = vmatprep.subr.bf16.mxu0 %v792_v14  ;;  %v836_v51 = vpack.c.bf16 %v88_v45, %v84_v44  ;;  %v87_v53 = vld [vmem:[#allocation7 + $0x60] sm:$0xff]  ;;  %v85_v54 = vld [vmem:[#allocation7 + $0x50] sm:$0xff]  ;;  %v868_v55 = vpack.c.bf16 %v90_v47, %v86_v46  ;;  %v92_v57 = vld [vmem:[#allocation7 + $0x88] sm:$0xff]  ;;  %v60_v44 = vlaneseq }
  0x3d   :  { %825 = vmatprep.subr.bf16.mxu1 %v824_v18  ;;  %v89_v56 = vld [vmem:[#allocation7 + $0x70] sm:$0xff]  ;;  %v96_v58 = vld [vmem:[#allocation7 + $0xa8] sm:$0xff]  ;;  %v94_v59 = vld [vmem:[#allocation7 + $0x98] sm:$0xff]  ;;  %v838_v61 = vpack.c.bf16 %v87_v53, %v83_v52 }
  0x3e   :  { %v98_v60 = vld [vmem:[#allocation7 + $0xb8] sm:$0xff]  ;;  %v870_v62 = vpack.c.bf16 %v89_v56, %v85_v54  ;;  %v840_v63 = vpack.c.bf16 %v96_v58, %v92_v57  ;;  %v91_v0 = vld [vmem:[#allocation7 + $0x80] sm:$0xff]  ;;  %v93_v2 = vld [vmem:[#allocation7 + $0x90] sm:$0xff]  ;;  %v61_v58 = vand.u32 127, %v60_v44 }
  0x3f   :  { %795 = vmatpush1.bf16.msra.mxu0 %v794_v24  ;;  %v95_v1 = vld [vmem:[#allocation7 + $0xa0] sm:$0xff]  ;;  %v872_v3 = vpack.c.bf16 %v98_v60, %v94_v59  ;;  %v97_v4 = vld [vmem:[#allocation7 + $0xb0] sm:$0xff]  ;;  %v100_v5 = vld [vmem:[#allocation7 + $0xc8] sm:$0xff] }
  0x40   :  { %827 = vmatpush1.bf16.msra.mxu1 %v826_v25  ;;  %797 = vmatprep.subr.bf16.mxu0 %v796_v26  ;;  %v104_v6 = vld [vmem:[#allocation7 + $0xe8] sm:$0xff]  ;;  %v102_v8 = vld [vmem:[#allocation7 + $0xd8] sm:$0xff]  ;;  %v842_v10 = vpack.c.bf16 %v95_v1, %v91_v0  ;;  %v874_v11 = vpack.c.bf16 %v97_v4, %v93_v2  ;;  %v99_v13 = vld [vmem:[#allocation7 + $0xc0] sm:$0xff] }
  0x41   :  { %829 = vmatprep.subr.bf16.mxu1 %v828_v30  ;;  %v106_v9 = vld [vmem:[#allocation7 + $0xf8] sm:$0xff]  ;;  %v844_v12 = vpack.c.bf16 %v104_v6, %v100_v5  ;;  %v103_v14 = vld [vmem:[#allocation7 + $0xe0] sm:$0xff]  ;;  %v101_v15 = vld [vmem:[#allocation7 + $0xd0] sm:$0xff] }
  0x42   :  { %v876_v16 = vpack.c.bf16 %v106_v9, %v102_v8  ;;  %v105_v17 = vld [vmem:[#allocation7 + $0xf0] sm:$0xff]  ;;  %v108_v18 = vld [vmem:[#allocation7 + $0x108] sm:$0xff]  ;;  %v110_v20 = vld [vmem:[#allocation7 + $0x118] sm:$0xff]  ;;  %v846_v22 = vpack.c.bf16 %v103_v14, %v99_v13 }
  0x43   :  { %799 = vmatpush1.bf16.msra.mxu0 %v798_v36  ;;  %v112_v19 = vld [vmem:[#allocation7 + $0x128] sm:$0xff]  ;;  %v114_v21 = vld [vmem:[#allocation7 + $0x138] sm:$0xff]  ;;  %v878_v23 = vpack.c.bf16 %v105_v17, %v101_v15  ;;  %v107_v25 = vld [vmem:[#allocation7 + $0x100] sm:$0xff] }
  0x44   :  { %831 = vmatpush1.bf16.msra.mxu1 %v830_v37  ;;  %833 = vmatprep.subr.bf16.mxu0 %v832_v38  ;;  %v848_v24 = vpack.c.bf16 %v112_v19, %v108_v18  ;;  %v111_v26 = vld [vmem:[#allocation7 + $0x120] sm:$0xff]  ;;  %v109_v27 = vld [vmem:[#allocation7 + $0x110] sm:$0xff]  ;;  %v880_v28 = vpack.c.bf16 %v114_v21, %v110_v20  ;;  %v116_v30 = vld [vmem:[#allocation7 + $0x148] sm:$0xff]  ;;  %v490_v19 = vshrl.u32 %v60_v44, 7 }
  0x45   :  { %865 = vmatprep.subr.bf16.mxu1 %v864_v42  ;;  %v113_v29 = vld [vmem:[#allocation7 + $0x130] sm:$0xff]  ;;  %v120_v31 = vld [vmem:[#allocation7 + $0x168] sm:$0xff]  ;;  %v118_v32 = vld [vmem:[#allocation7 + $0x158] sm:$0xff]  ;;  %v850_v34 = vpack.c.bf16 %v111_v26, %v107_v25 }
  0x46   :  { %268 = vmatmul.mubr.f32.vlgmr.msra.gmra.mrb[0].mxu0 %v1060_v48  ;;  %v122_v33 = vld [vmem:[#allocation7 + $0x178] sm:$0xff]  ;;  %v882_v35 = vpack.c.bf16 %v113_v29, %v109_v27  ;;  %v852_v36 = vpack.c.bf16 %v120_v31, %v116_v30  ;;  %v115_v37 = vld [vmem:[#allocation7 + $0x140] sm:$0xff]  ;;  %v117_v39 = vld [vmem:[#allocation7 + $0x150] sm:$0xff]  ;;  %v491_v20 = vsub.s32 0, %v490_v19  ;;  %v495_v21 = vsub.s32 1, %v490_v19 }
  0x47   :  { %339 = vmatmul.mubr.f32.vlgmr.msra.gmra.mrb[0].mxu1 %v1060_v48  ;;  %835 = vmatpush1.bf16.msra.mxu0 %v834_v49  ;;  %v119_v38 = vld [vmem:[#allocation7 + $0x160] sm:$0xff]  ;;  %v884_v40 = vpack.c.bf16 %v122_v33, %v118_v32  ;;  %v121_v41 = vld [vmem:[#allocation7 + $0x170] sm:$0xff]  ;;  %v124_v42 = vld [vmem:[#allocation7 + $0x188] sm:$0xff] }
  0x48   :  { %867 = vmatpush1.bf16.msra.mxu1 %v866_v50  ;;  %837 = vmatprep.subr.bf16.mxu0 %v836_v51  ;;  %v128_v43 = vld [vmem:[#allocation7 + $0x1a8] sm:$0xff]  ;;  %v126_v45 = vld [vmem:[#allocation7 + $0x198] sm:$0xff]  ;;  %v854_v47 = vpack.c.bf16 %v119_v38, %v115_v37  ;;  %v886_v49 = vpack.c.bf16 %v121_v41, %v117_v39  ;;  %v123_v51 = vld [vmem:[#allocation7 + $0x180] sm:$0xff] }
  0x49   :  { %869 = vmatprep.subr.bf16.mxu1 %v868_v55  ;;  %409 = vmatprep.mubr.f32.mxu0 %v985_v7  ;;  %v130_v46 = vld [vmem:[#allocation7 + $0x1b8] sm:$0xff]  ;;  %v856_v50 = vpack.c.bf16 %v128_v43, %v124_v42  ;;  %v127_v52 = vld [vmem:[#allocation7 + $0x1a0] sm:$0xff]  ;;  %v125_v53 = vld [vmem:[#allocation7 + $0x190] sm:$0xff] }
  0x4a   :  { %480 = vmatprep.mubr.f32.mxu1 %v985_v7  ;;  %v888_v54 = vpack.c.bf16 %v130_v46, %v126_v45  ;;  %v129_v55 = vld [vmem:[#allocation7 + $0x1b0] sm:$0xff]  ;;  %v132_v56 = vld [vmem:[#allocation7 + $0x1c8] sm:$0xff]  ;;  %v134_v59 = vld [vmem:[#allocation7 + $0x1d8] sm:$0xff] }
  0x4b   :  { %839 = vmatpush1.bf16.msra.mxu0 %v838_v61  ;;  %v136_v57 = vld [vmem:[#allocation7 + $0x1e8] sm:$0xff]  ;;  %v138_v60 = vld [vmem:[#allocation7 + $0x1f8] sm:$0xff]  ;;  %v63_v61 = vstv %s1066_s1  ;;  %v890_v0 = vpack.c.bf16 %v129_v55, %v125_v53  ;;  %v131_v2 = vld [vmem:[#allocation7 + $0x1c0] sm:$0xff] }
  0x4c   :  { %871 = vmatpush1.bf16.msra.mxu1 %v870_v62  ;;  %841 = vmatprep.subr.bf16.mxu0 %v840_v63  ;;  %v68_v62 = vstv %s1068_s28  ;;  %v858_v63 = vpack.c.bf16 %v127_v52, %v123_v51  ;;  %v860_v1 = vpack.c.bf16 %v136_v57, %v132_v56  ;;  %v892_v4 = vpack.c.bf16 %v138_v60, %v134_v59  ;;  %v133_v5 = vld [vmem:[#allocation7 + $0x1d0] sm:$0xff]  ;;  %v560_v13 = vld [vmem:[%s1119_s2] sm:$0xff]  ;;  %v561_v14 = vld [vmem:[%s1119_s2 + $0x8] sm:$0xff] }
  0x4d   :  { %873 = vmatprep.subr.bf16.mxu1 %v872_v3  ;;  %v135_v3 = vld [vmem:[#allocation7 + $0x1e0] sm:$0xff]  ;;  %v137_v6 = vld [vmem:[#allocation7 + $0x1f0] sm:$0xff]  ;;  %vm64_vm0 = vcmp.eq.s32.totalorder %v61_v58, %v63_v61  ;;  %vm69_vm1 = vcmp.eq.s32.totalorder %v61_v58, %v68_v62  ;;  %v562_v15 = vmax.f32 %v560_v13, 0.0 }
  0x4e   :  { %v862_v8 = vpack.c.bf16 %v135_v3, %v131_v2  ;;  %v894_v9 = vpack.c.bf16 %v137_v6, %v133_v5  ;;  %v564_v17 = vld [vmem:[%s1120_s3] sm:$0x1]  ;;  %v565_v18 = vld [vmem:[%s1120_s3 + $0x1] sm:$0x1] }
  0x4f   :  { %843 = vmatpush1.bf16.msra.mxu0 %v842_v10  ;;  %v744_v10 = vsel %vm64_vm0, 1.0, %v985_v7  ;;  %v749_v52 = vld [vmem:[%s1123_s6] ss:$0 sm:$0xff]  ;;  %s987_s6 = smov [#allocation8]  }
  0x50   :  { %875 = vmatpush1.bf16.msra.mxu1 %v874_v11  ;;  %845 = vmatprep.subr.bf16.mxu0 %v844_v12  ;;  %v746_v11 = vsel %vm69_vm1, 1.0, %v985_v7  ;;  %s727_s0 = sshll.u32 %s987_s6, 4  ;;  %s728_s0 = int_to_ptr.vmem [resolvable:$true] %s727_s0 }
  0x51   :  { %877 = vmatprep.subr.bf16.mxu1 %v876_v16  ;;  %v73_v12 = vsel %vm72_vm2, %v744_v10, %v746_v11  ;;  %v563_v16 = vmax.f32 %v561_v14, 0.0  ;;  %p958_p0 = scmp.lt.s32.totalorder %s728_s0, %s728_s0 }
  0x53   :  { %847 = vmatpush1.bf16.msra.mxu0 %v846_v22 }
  0x54   :  { %879 = vmatpush1.bf16.msra.mxu1 %v878_v23  ;;  %849 = vmatprep.subr.bf16.mxu0 %v848_v24 }
  0x55   :  { %881 = vmatprep.subr.bf16.mxu1 %v880_v28 }
  0x57   :  { %851 = vmatpush1.bf16.msra.mxu0 %v850_v34  ;;  %v503_v34 = vsub.s32 3, %v490_v19 }
  0x58   :  { %883 = vmatpush1.bf16.msra.mxu1 %v882_v35  ;;  %853 = vmatprep.subr.bf16.mxu0 %v852_v36  ;;  %v499_v35 = vsub.s32 2, %v490_v19 }
  0x59   :  { %885 = vmatprep.subr.bf16.mxu1 %v884_v40 }
  0x5b   :  { %855 = vmatpush1.bf16.msra.mxu0 %v854_v47 }
  0x5c   :  { %887 = vmatpush1.bf16.msra.mxu1 %v886_v49  ;;  %857 = vmatprep.subr.bf16.mxu0 %v856_v50 }
  0x5d   :  { %889 = vmatprep.subr.bf16.mxu1 %v888_v54 }
  0x5f   :  { %859 = vmatpush1.bf16.msra.mxu0 %v858_v63 }
  0x60   :  { %891 = vmatpush1.bf16.msra.mxu1 %v890_v0  ;;  %861 = vmatprep.subr.bf16.mxu0 %v860_v1 }
  0x61   :  { %893 = vmatprep.subr.bf16.mxu1 %v892_v4 }
  0x63   :  { %863 = vmatpush1.bf16.msra.mxu0 %v862_v8 }
  0x64   :  { %895 = vmatpush1.bf16.msra.mxu1 %v894_v9  ;;  %758 = vmatprep.subr.mxu0 %v985_v7 }
  0x65   :  { %763 = vmatprep.subr.mxu1 %v985_v7 }
  0x66   :  { %410 = vmatmul.mubr.f32.vlgmr.msra.gmra.mrb[0].mxu0 %v73_v12 }
  0x67   :  { %481 = vmatmul.mubr.f32.vlgmr.msra.gmra.mrb[0].mxu1 %v73_v12  ;;  %760 = vmatprep.mubr.msk.f32.mxu0 %vm986_vm3, %v985_v7 }
  0x68   :  { %765 = vmatprep.mubr.msk.f32.mxu1 %vm986_vm3, %v985_v7  ;;  %v487_v7 = vld [vmem:[%s1122_s5] sm:$0xf] }
  0x69   :  { %v492_v22 = vrot.slane %v487_v7, %v491_v20  ;;  %v496_v24 = vrot.slane %v487_v7, %v495_v21  ;;  %v504_v37 = vrot.slane %v487_v7, %v503_v34  ;;  %v500_v38 = vrot.slane %v487_v7, %v499_v35 }
  0x6c   :  { %759 = vmatpush3.xpose.msk.msra.mxu0 %vm566_vm4, %v562_v15 }
  0x6d   :  { %764 = vmatpush3.xpose.msk.msra.mxu1 %vm566_vm4, %v563_v16 }
  0x6f   :  { %761 = vmatmul.mubr.msk.f32.vlgmr.msra.gmra.mrb[2].mxu0 %vm566_vm4, %v564_v17 }
  0x70   :  { %766 = vmatmul.mubr.msk.f32.vlgmr.msra.gmra.mrb[2].mxu1 %vm566_vm4, %v565_v18 }
 0x139   :  { %v411_v23 = vpop.f32.mrb[0].mxu0 }
 0x13a   :  { %v509_v25 = vadd.f32 %v492_v22, %v411_v23  ;;  %v482_v26 = vpop.f32.mrb[0].mxu1  ;;  %v413_v27 = vpop.f32.mrb[1].mxu0 }
 0x13b   :  { %v484_v28 = vpop.f32.mrb[1].mxu1  ;;  %v510_v30 = vadd.f32 %v496_v24, %v413_v27  ;;  %v511_v42 = vadd.f32 %v500_v38, %v482_v26 }
 0x13c   :  { %v747_v29 = vmul.f32 -1.442695, %v509_v25  ;;  %v512_v40 = vadd.f32 %v504_v37, %v484_v28 }
 0x13d   :  { %v748_v31 = vmul.f32 -1.442695, %v510_v30 }
 0x13e   :  { %909 = vpow2.f32 %v747_v29 }
 0x13f   :  { %911 = vpow2.f32 %v748_v31 }
 0x142   :  { %v639_v56 = vpop.f32.mrb[2].mxu0 }
 0x143   :  { %v715_v57 = vpop.f32.mrb[2].mxu1  ;;  %v762_v58 = vpop.f32.mrb[3].mxu0 }
 0x144   :  { %v767_v59 = vpop.f32.mrb[3].mxu1 }
 0x148   :  { %v910_v32 = vpop.eup %909 }
 0x149   :  { %v516_v33 = vadd.f32 1.0, %v910_v32  ;;  %v912_v36 = vpop.eup %911 }
 0x14a   :  { %v522_v39 = vadd.f32 1.0, %v912_v36 }
 0x14b   :  { %913 = vrcp.f32 %v516_v33 }
 0x14c   :  { %915 = vrcp.f32 %v522_v39 }
 0x155   :  { %v914_v41 = vpop.eup %913 }
 0x156   :  { %v525_v43 = vmul.f32 %v914_v41, %v512_v40  ;;  %v916_v45 = vpop.eup %915 }
 0x157   :  { %v528_v46 = vsub.f32 1.0, %v916_v45  ;;  %v530_v50 = vmul.f32 %v916_v45, %v1060_v48  ;;  %v547_v48 = vstv %s1124_s7 }
 0x158   :  { %v526_v44 = vadd.f32 %v525_v43, %v511_v42 }
 0x15a   :  { %917 = vtanh.f32 %v526_v44 }
 0x164   :  { %v918_v47 = vpop.eup %917 }
 0x165   :  { %v529_v49 = vmul.f32 %v918_v47, %v528_v46 }
 0x167   :  { %v531_v51 = vadd.f32 %v530_v50, %v529_v49 }
 0x169   :  { %532 = vst [vmem:[%s1126_s9] sm:$0x3] %v531_v51  ;;  %v533_v53 = vmax.f32 %v531_v51, 0.0  ;;  %s953_s9 = scalar_lea.vmem %s728_s0, 32 }
 0x16a   :  { %p954_p13 = scmp.ne.s32.totalorder %s728_s0, %s953_s9  ;;  %p959_p1 = scmp.lt.s32.totalorder %s953_s9, %s953_s9 }
 0x16b   :  { %v541_v54 = vmul.f32 %v749_v52, %v533_v53 }
 0x16c   :  { %p960_p2 = por %p959_p1, %p958_p0 }
 0x16d   :  { %v543_v55 = vsel %vm542_vm5, %v541_v54, 0.0 }
 0x16e   :  { %544 = vadd.xlane.f32.xlu0 %v543_v55  ;;  %p961_p3 = pnand %p960_p2, %p954_p13 }
 0x1fb   :  { %v545_v60 = vpop.xlane.xlu0 %544 }
 0x1fc   :  { %v548_v61 = vadd.f32 %v547_v48, %v545_v60 }
 0x1fe   :  { %v553_v62 = vrot.slane %v548_v61, %v491_v20  ;;  %v557_v63 = vrot.slane %v548_v61, %v495_v21 }
 0x200   :  { %v640_v0 = vadd.f32 %v639_v56, %v553_v62  ;;  %v716_v1 = vadd.f32 %v715_v57, %v557_v63 }
 0x202   :  { %720 = vst.msk [vmem:[#allocation8] sm:$0x1] %vm719_vm6, %v640_v0  ;;  %721 = vst.msk [vmem:[#allocation8 + $0x1] sm:$0x1] %vm719_vm6, %v716_v1 }
 0x203   :  { %964 = shalt.err (!%p961_p3)
}
 0x204   :  { %s965_s22 = scalar_lea.hbm %s1125_s8, 32 }
 0x205   :  { %p966_p4 = scmp.ne.s32.totalorder %s1125_s8, %s965_s22  ;;  %p969_p5 = scmp.lt.u32.totalorder %s965_s22, %s1125_s8 }
 0x207   :  { %p971_p6 = pnand %p969_p5, %p966_p4 }
 0x209   :  { %974 = shalt.err (!%p971_p6)
}
 0x20a   :  { %s988_s4 = smov 16   ;;  %s989_s27 = smov 1  }
 0x20b   :  { %733 = dma.vmem_to_hbm [thread:$0]  %s728_s0, 32, %s1125_s8, [#allocation5], %s988_s4, %s988_s4, %s989_s27  }
 0x20c   :  { %979 = dma.done.wait [#allocation5], 32  }
 0x20d   :  { %980 = vsyncadd [#allocation5], 4294967264 }
 0x20e   :  { %741 = vsyncpa [#allocation4], 1 }
 0x20f   :  { %742 = vsyncpa [#allocation5], 1 }
 0x210   :  { %743 = vsyncpa [#allocation6], 1 }

</bundles_post_ra>
